<compile_context>
chip_gen: v7x
topology: tpu7x:2x2x1
jax: 0.10.0
libtpu: 0.0.40
codegen_flags: <defaults>
</compile_context>

<pallas_src>
import functools

import jax
import jax.numpy as jnp
import numpy as np
from jax.experimental import pallas as pl
from jax.experimental.pallas import tpu as pltpu

LANES = 128
MAX_BLOCK_ROWS = 4096  # 4096*128*4B = 2 MiB per f32 input per block


# ----------------------------- Pallas kernel ------------------------------ #

def _masked_mse_kernel(p_ref, t_ref, acc_ref, *,
                       steps_per_split, n_blocks, block_rows, valid_rows):
    """One block of the streaming sum-of-squared-differences reduction.

    p_ref, t_ref : (block_rows, 128) tiles of the flattened inputs (native dtype).
    acc_ref      : (8, 128) f32 output block, resident across the inner axis
                   (one partial-sum block per outer split).
    """
    c = pl.program_id(0)          # split index ("parallel" axis)
    i = pl.program_id(1)          # reduction step within the split ("arbitrary")

    @pl.when(i == 0)
    def _init():
        acc_ref[...] = jnp.zeros_like(acc_ref)

    g = c * steps_per_split + i   # global block index (runtime scalar)

    def block_partial(mask_tail):
        # Load in native dtype (keeps HBM traffic minimal for bf16 inputs),
        # upcast to f32 for the arithmetic / accumulation.
        p = p_ref[...].astype(jnp.float32)
        t = t_ref[...].astype(jnp.float32)
        d = p - t
        sq = d * d
        # The original ~((p==0)&(t==0)) mask is dropped: it never changes the
        # sum (see module-level comment).
        if mask_tail:
            # Only the last real block can over-read past the array; zero out
            # the out-of-range rows (their contents are undefined).
            row = jax.lax.broadcasted_iota(jnp.int32, sq.shape, 0)
            n_valid = valid_rows - g * block_rows
            sq = jnp.where(row < n_valid, sq, 0.0)
        # (block_rows,128) -> (block_rows//8, 8, 128): layout-preserving split
        # of the sublane-major dim; sum over axis 0 is pure vreg-vreg adds.
        return jnp.sum(sq.reshape(-1, 8, sq.shape[-1]), axis=0)

    tail_ragged = (valid_rows % block_rows) != 0

    if tail_ragged:
        @pl.when(g < n_blocks - 1)
        def _full():
            acc_ref[...] += block_partial(False)

        @pl.when(g == n_blocks - 1)
        def _tail():
            acc_ref[...] += block_partial(True)
    else:
        # Blocks with g >= n_blocks (over-allocation from the core split) are
        # skipped entirely.
        @pl.when(g < n_blocks)
        def _full():
            acc_ref[...] += block_partial(False)


# ------------------------------- Wrapper ----------------------------------- #

def masked_mse_loss(predictions, targets):
    """Masked MSE loss matching the PyTorch MaskedMSELoss.forward semantics."""
    assert predictions.shape == targets.shape, "shapes must match"
    n_elems = int(np.prod(predictions.shape))
    assert n_elems > 0

    p1 = predictions.reshape(-1)
    t1 = targets.reshape(-1)
    # Keep native floating dtype (bf16 stays packed in HBM); only promote
    # non-floating inputs.
    if not jnp.issubdtype(p1.dtype, jnp.floating):
        p1 = p1.astype(jnp.float32)
    if not jnp.issubdtype(t1.dtype, jnp.floating):
        t1 = t1.astype(jnp.float32)

    rem = n_elems % LANES
    if rem:
        # TODO(synk): this pad is one extra copy of the inputs; it is only
        # reached when numel % 128 != 0 (rare for NN tensors).  Padding with
        # zeros is mask-inert: (0-0)^2 == 0, and we divide by the true count.
        pad = LANES - rem
        p1 = jnp.pad(p1, (0, pad))
        t1 = jnp.pad(t1, (0, pad))

    rows = p1.shape[0] // LANES
    p2 = p1.reshape(rows, LANES)      # zero-copy when rem == 0
    t2 = t1.reshape(rows, LANES)

    # Sublane multiple: 8 rows for 4-byte dtypes, 16 for bf16/f16, 32 for 1B.
    min_itemsize = min(p2.dtype.itemsize, t2.dtype.itemsize)
    sub_mult = max(8, 32 // min_itemsize)
    block_rows = min(MAX_BLOCK_ROWS,
                     ((rows + sub_mult - 1) // sub_mult) * sub_mult)
    n_blocks = (rows + block_rows - 1) // block_rows

    # Two partitions so multi-TensorCore chips (v7x) can shard the stream.
    num_splits = 2 if n_blocks >= 2 else 1
    steps = (n_blocks + num_splits - 1) // num_splits

    kernel = functools.partial(
        _masked_mse_kernel,
        steps_per_split=steps, n_blocks=n_blocks,
        block_rows=block_rows, valid_rows=rows)

    def in_map(c, i):
        # Clamp so over-allocated steps (skipped in the kernel) stay in range.
        return (jnp.minimum(c * steps + i, n_blocks - 1), 0)

    partials = pl.pallas_call(
        kernel,
        out_shape=jax.ShapeDtypeStruct((num_splits * 8, LANES), jnp.float32),
        grid_spec=pltpu.PrefetchScalarGridSpec(
            num_scalar_prefetch=0,
            grid=(num_splits, steps),
            in_specs=[
                pl.BlockSpec((block_rows, LANES), in_map),
                pl.BlockSpec((block_rows, LANES), in_map),
            ],
            out_specs=pl.BlockSpec((8, LANES), lambda c, i: (c, 0)),
        ),
        compiler_params=pltpu.CompilerParams(
            dimension_semantics=("parallel", "arbitrary")),
    )(p2, t2)

    # Tiny final reduce (<= 16x128 f32) + mean scaling in plain XLA.
    return jnp.sum(partials) * (1.0 / n_elems)


# ------------------------- numpy reference (check) ------------------------ #

def ref_masked_mse(predictions, targets):
    p = np.asarray(predictions, dtype=np.float32)
    t = np.asarray(targets, dtype=np.float32)
    elementwise = (p - t) ** 2
    mask = ~((p == 0.0) & (t == 0.0))
    return (elementwise * mask.astype(np.float32)).mean()


# --------------------------------- main ----------------------------------- #

if __name__ == "__main__":
    N, C, H, W = 2, 4, 16, 16

    key = jax.random.PRNGKey(0)
    kp, kt, km = jax.random.split(key, 3)

    pred = jax.random.normal(kp, (N, C, H, W), dtype=jnp.float32)
    targ = jax.random.normal(kt, (N, C, H, W), dtype=jnp.float32)

    # Zero out a joint region so the mask condition is exercised ...
    joint_zero = jax.random.bernoulli(km, 0.25, (N, C, H, W))
    pred = jnp.where(joint_zero, 0.0, pred)
    targ = jnp.where(joint_zero, 0.0, targ)
    # ... plus some prediction-only zeros (mask stays True there).
    pred = pred.at[0, 0, 0, :4].set(0.0)

    loss = masked_mse_loss(pred, targ)
    loss = jax.block_until_ready(loss)

    loss_ref = ref_masked_mse(pred, targ)
    np.testing.assert_allclose(np.asarray(loss), loss_ref, rtol=1e-5, atol=1e-6)

    print("KERNEL_OK")
</pallas_src>

<mosaic_0001>
module attributes {stable_mosaic.version = 11 : i64} {
  func.func @_masked_mse_kernel(%arg0: i32, %arg1: i32, %arg2: memref<16x128xf32, #tpu.memory_space<vmem>>, %arg3: memref<16x128xf32, #tpu.memory_space<vmem>>, %arg4: memref<8x128xf32, #tpu.memory_space<vmem>>) attributes {dimension_semantics = [#tpu.dimension_semantics<parallel>, #tpu.dimension_semantics<arbitrary>], iteration_bounds = array<i64: 1, 1>, scalar_prefetch = 0 : i64, scratch_operands = 0 : i64, tpu.core_type = #tpu.core_type<tc>, window_params = [{transform_indices = @transform_0, window_bounds = array<i64: 16, 128>}, {transform_indices = @transform_1, window_bounds = array<i64: 16, 128>}, {transform_indices = @transform_2, window_bounds = array<i64: 8, 128>}]} {
    %c0_i32 = arith.constant 0 : i32
    %0 = arith.cmpi eq, %arg1, %c0_i32 : i32
    %1 = arith.extui %0 : i1 to i32
    %c0_i32_0 = arith.constant 0 : i32
    %2 = arith.cmpi ne, %1, %c0_i32_0 : i32
    scf.if %2 {
      %cst = arith.constant 0.000000e+00 : f32
      %8 = vector.broadcast %cst : f32 to vector<8x128xf32>
      %c0 = arith.constant 0 : index
      %c0_3 = arith.constant 0 : index
      %9 = vector.load %arg4[%c0, %c0_3] : memref<8x128xf32, #tpu.memory_space<vmem>>, vector<8x128xf32>
      tpu.vector_store %arg4[%c0, %c0_3], %8 {strides = array<i32>} : memref<8x128xf32, #tpu.memory_space<vmem>>, vector<8x128xf32>,
    } else {
    }
    %c1_i32 = arith.constant 1 : i32
    %3 = arith.muli %arg0, %c1_i32 : i32
    %4 = arith.addi %3, %arg1 : i32
    %c1_i32_1 = arith.constant 1 : i32
    %5 = arith.cmpi slt, %4, %c1_i32_1 : i32
    %6 = arith.extui %5 : i1 to i32
    %c0_i32_2 = arith.constant 0 : i32
    %7 = arith.cmpi ne, %6, %c0_i32_2 : i32
    scf.if %7 {
      %c0 = arith.constant 0 : index
      %c0_3 = arith.constant 0 : index
      %8 = vector.load %arg4[%c0, %c0_3] : memref<8x128xf32, #tpu.memory_space<vmem>>, vector<8x128xf32>
      %c0_4 = arith.constant 0 : index
      %c0_5 = arith.constant 0 : index
      %9 = vector.load %arg2[%c0_4, %c0_5] : memref<16x128xf32, #tpu.memory_space<vmem>>, vector<16x128xf32>
      %c0_6 = arith.constant 0 : index
      %c0_7 = arith.constant 0 : index
      %10 = vector.load %arg3[%c0_6, %c0_7] : memref<16x128xf32, #tpu.memory_space<vmem>>, vector<16x128xf32>
      %11 = arith.subf %9, %10 : vector<16x128xf32>
      %12 = arith.mulf %11, %11 : vector<16x128xf32>
      %13 = vector.shape_cast %12 : vector<16x128xf32> to vector<2x8x128xf32>
      %cst = arith.constant dense<0.000000e+00> : vector<8x128xf32>
      %14 = vector.multi_reduction <add>, %13, %cst [0] : vector<2x8x128xf32> to vector<8x128xf32>
      %15 = arith.addf %8, %14 : vector<8x128xf32>
      %c0_8 = arith.constant 0 : index
      %c0_9 = arith.constant 0 : index
      %16 = vector.load %arg4[%c0_8, %c0_9] : memref<8x128xf32, #tpu.memory_space<vmem>>, vector<8x128xf32>
      tpu.vector_store %arg4[%c0_8, %c0_9], %15 {strides = array<i32>} : memref<8x128xf32, #tpu.memory_space<vmem>>, vector<8x128xf32>,
    } else {
    }
    return
  }
  func.func @transform_0(%arg0: i32, %arg1: i32) -> (i32, i32) {
    %c1_i32 = arith.constant 1 : i32
    %0 = arith.muli %arg0, %c1_i32 : i32
    %1 = arith.addi %0, %arg1 : i32
    %c0_i32 = arith.constant 0 : i32
    %2 = arith.minsi %1, %c0_i32 : i32
    %c0_i32_0 = arith.constant 0 : i32
    %c0_i32_1 = arith.constant 0 : i32
    return %2, %c0_i32_0 : i32, i32
  }
  func.func @transform_1(%arg0: i32, %arg1: i32) -> (i32, i32) {
    %c1_i32 = arith.constant 1 : i32
    %0 = arith.muli %arg0, %c1_i32 : i32
    %1 = arith.addi %0, %arg1 : i32
    %c0_i32 = arith.constant 0 : i32
    %2 = arith.minsi %1, %c0_i32 : i32
    %c0_i32_0 = arith.constant 0 : i32
    %c0_i32_1 = arith.constant 0 : i32
    return %2, %c0_i32_0 : i32, i32
  }
  func.func @transform_2(%arg0: i32, %arg1: i32) -> (i32, i32) {
    %c0_i32 = arith.constant 0 : i32
    %c0_i32_0 = arith.constant 0 : i32
    return %arg0, %c0_i32 : i32, i32
  }
}

</mosaic_0001>

<bundles_post_ra>
// kernel: tpu_custom_call.1
= control target key start
LH: loop header
LB: loop body
LE: loop exit
PB: predicated region body
PF: predicated region fallthrough
CT: control target
= control target key end

     0   :  { %7 = vsyncpa [#allocation3], 0  ;;  %s236_s0 = inlined_call_operand.hbm [shape: f32[16,128], index: 0, kind: input, shape index: {}]   ;;  %s237_s1 = inlined_call_operand.hbm [shape: f32[16,128], index: 1, kind: input, shape index: {}]   ;;  %s238_s2 = inlined_call_operand.hbm [shape: f32[8,128], index: 2, kind: output, shape index: {}]  }
   0x1   :  { %8 = vsyncpa [#allocation6], 0 }
   0x2   :  { %9 = vsyncpa [#allocation4], 0  ;;  %s180_s9 = smov [#allocation2]   ;;  %s108_s13 = scalar_lea.hbm %s236_s0, 256 }
   0x3   :  { %s21_s10 = sshll.u32 %s180_s9, 4  ;;  %p109_p0 = scmp.ne.s32.totalorder %s236_s0, %s108_s13  ;;  %s22_s10 = int_to_ptr.vmem [resolvable:$true] %s21_s10 }
   0x4   :  { %p112_p1 = scmp.lt.u32.totalorder %s108_s13, %s236_s0 }
   0x6   :  { %p114_p2 = pnand %p112_p1, %p109_p0 }
   0x8   :  { %117 = shalt.err (!%p114_p2)
}
   0x9   :  { %s118_s18 = scalar_lea.vmem %s22_s10, 256  ;;  %p123_p4 = scmp.lt.s32.totalorder %s22_s10, %s22_s10 }
   0xa   :  { %p119_p3 = scmp.ne.s32.totalorder %s22_s10, %s118_s18  ;;  %p124_p5 = scmp.lt.s32.totalorder %s118_s18, %s118_s18 }
   0xc   :  { %p125_p6 = por %p124_p5, %p123_p4 }
   0xe   :  { %p126_p7 = pnand %p125_p6, %p119_p3 }
  0x10   :  { %129 = shalt.err (!%p126_p7)
}
  0x11   :  { %s181_s19 = smov 128   ;;  %s182_s20 = smov 8  }
  0x12   :  { %27 = dma.hbm_to_vmem [thread:$0]  %s236_s0, 256, %s22_s10, [#allocation3], %s181_s19, %s181_s19, %s182_s20  }
  0x13   :  { %s183_s23 = smov [#allocation5]   ;;  %s130_s27 = scalar_lea.hbm %s237_s1, 256 }
  0x14   :  { %s39_s24 = sshll.u32 %s183_s23, 4  ;;  %p131_p8 = scmp.ne.s32.totalorder %s237_s1, %s130_s27  ;;  %s40_s24 = int_to_ptr.vmem [resolvable:$true] %s39_s24 }
  0x15   :  { %p134_p9 = scmp.lt.u32.totalorder %s130_s27, %s237_s1 }
  0x17   :  { %p136_p10 = pnand %p134_p9, %p131_p8 }
  0x19   :  { %139 = shalt.err (!%p136_p10)
}
  0x1a   :  { %s140_s4 = scalar_lea.vmem %s40_s24, 256  ;;  %p145_p12 = scmp.lt.s32.totalorder %s40_s24, %s40_s24 }
  0x1b   :  { %p141_p11 = scmp.ne.s32.totalorder %s40_s24, %s140_s4  ;;  %p146_p13 = scmp.lt.s32.totalorder %s140_s4, %s140_s4 }
  0x1d   :  { %p147_p0 = por %p146_p13, %p145_p12 }
  0x1f   :  { %p148_p1 = pnand %p147_p0, %p141_p11 }
  0x21   :  { %151 = shalt.err (!%p148_p1)
}
  0x22   :  { %45 = dma.hbm_to_vmem [thread:$0]  %s237_s1, 256, %s40_s24, [#allocation6], %s181_s19, %s181_s19, %s182_s20  }
  0x23   :  { %174 = dma.done.wait [#allocation3], 256  }
  0x24   :  { %175 = vsyncadd [#allocation3], 4294967040 }
  0x25   :  { %176 = dma.done.wait [#allocation6], 256  }
  0x26   :  { %177 = vsyncadd [#allocation6], 4294967040  ;;  %v71_v0 = vld [vmem:[#allocation2] sm:$0xff]  ;;  %v72_v1 = vld [vmem:[#allocation2 + $0x8] sm:$0xff]  ;;  %s184_s6 = smov [#allocation7]  }
  0x27   :  { %v73_v2 = vld [vmem:[#allocation5] sm:$0xff]  ;;  %v74_v3 = vld [vmem:[#allocation5 + $0x8] sm:$0xff]  ;;  %s88_s7 = sshll.u32 %s184_s6, 4  ;;  %s89_s7 = int_to_ptr.vmem [resolvable:$true] %s88_s7 }
  0x28   :  { %v75_v4 = vsub.f32 %v71_v0, %v73_v2  ;;  %v76_v5 = vsub.f32 %v72_v1, %v74_v3  ;;  %s152_s8 = scalar_lea.vmem %s89_s7, 128  ;;  %p157_p3 = scmp.lt.s32.totalorder %s89_s7, %s89_s7 }
  0x29   :  { %p153_p2 = scmp.ne.s32.totalorder %s89_s7, %s152_s8  ;;  %p158_p4 = scmp.lt.s32.totalorder %s152_s8, %s152_s8 }
  0x2a   :  { %v77_v6 = vmul.f32 %v75_v4, %v75_v4  ;;  %v78_v7 = vmul.f32 %v76_v5, %v76_v5 }
  0x2b   :  { %p159_p5 = por %p158_p4, %p157_p3 }
  0x2c   :  { %v79_v8 = vadd.f32 %v78_v7, %v77_v6 }
  0x2d   :  { %p160_p6 = pnand %p159_p5, %p153_p2 }
  0x2e   :  { %81 = vst [vmem:[#allocation7] sm:$0xff] %v79_v8 }
  0x2f   :  { %163 = shalt.err (!%p160_p6)
}
  0x30   :  { %s164_s10 = scalar_lea.hbm %s238_s2, 128 }
  0x31   :  { %p165_p7 = scmp.ne.s32.totalorder %s238_s2, %s164_s10  ;;  %p168_p8 = scmp.lt.u32.totalorder %s164_s10, %s238_s2 }
  0x33   :  { %p170_p9 = pnand %p168_p8, %p165_p7 }
  0x35   :  { %173 = shalt.err (!%p170_p9)
}
  0x36   :  { %91 = dma.vmem_to_hbm [thread:$0]  %s89_s7, 128, %s238_s2, [#allocation4]  }
  0x37   :  { %178 = dma.done.wait [#allocation4], 128  }
  0x38   :  { %179 = vsyncadd [#allocation4], 4294967168 }
  0x39   :  { %95 = vsyncpa [#allocation3], 1 }
  0x3a   :  { %96 = vsyncpa [#allocation6], 1 }
  0x3b   :  { %97 = vsyncpa [#allocation4], 1 }

</bundles_post_ra>
